<compile_context>
chip_gen: v5e
topology: v5e:2x2
jax: 0.10.0
libtpu: 0.0.40
codegen_flags: <defaults>
</compile_context>

<pallas_src>
import functools

import jax
import jax.numpy as jnp
from jax.experimental import pallas as pl
from jax.experimental.pallas import tpu as pltpu


def _cdiv(a, b):
    return -(-a // b)


def prepare_ngram_weight(weight, n_gram):
    """Build W_wide with W_wide[:, g*H:(g+1)*H] = W_g.T via one reshape/transpose.

    weight: (H, n_gram*H) -- PyTorch nn.Linear(n_gram*H, H).weight
    Hoist this out of the per-call forward path (once per weight update) if desired.
    """
    H = weight.shape[0]
    return weight.reshape(H, n_gram, H).transpose(2, 1, 0).reshape(H, n_gram * H)


def _default_vmem_limit_bytes():
    """Generation-aware scoped-VMEM request (128 MiB parts -> 64 MiB, 64 MiB parts -> 32 MiB)."""
    cap = 128 * 1024 * 1024
    try:
        info = pltpu.get_tpu_info()
        cap = int(getattr(info, "vmem_capacity_bytes", cap))
    except Exception:
        pass
    return int(min(cap // 2, 64 * 1024 * 1024))


def _default_seq_tile(H, n_gram, itemsize, vmem_limit, row_chunk):
    """Pick a seq tile from the VMEM budget, counting the double-buffered resident W."""
    halo = n_gram - 1
    w_bytes = 2 * H * (n_gram * H) * itemsize                 # double-buffered W_wide
    chunk_tmp = 6 * (row_chunk + halo) * (n_gram * H) * 4     # wide-matmul result + epilogue temps
    budget = int(vmem_limit * 0.75) - w_bytes - chunk_tmp - (1 << 20)
    per_row = 4 * H * itemsize                                # x + out tiles, double-buffered
    rows = budget // max(per_row, 1)
    cap_rows = 1024 if vmem_limit >= (48 << 20) else 512
    rows = max(8, min(rows, cap_rows))
    return int((rows // 8) * 8)


def _ngram_mlp_kernel(x_ref, halo_ref, w_ref, b_ref, o_ref, *, n_gram, s_t, h, row_chunk):
    """One (batch element, seq tile) grid step; fully independent of other steps.

    x_ref:    (1, s_t, H)                input tile (native H)
    halo_ref: (1, 1, max(n_gram-1,1), H) previous (n_gram-1) rows of x (zeros at seq start)
    w_ref:    (H, n_gram*H)              W_wide (resident, constant index_map)
    b_ref:    (1, H)                     bias
    o_ref:    (1, s_t, H)                output tile (native H)
    """
    halo = n_gram - 1
    w = w_ref[...]                                     # streamed from VMEM by the MXU
    bias_f = b_ref[...].astype(jnp.float32)            # (1, H), hoisted out of the chunk loop

    prev_tail = None
    if halo > 0:
        prev_tail = halo_ref[0, 0]                     # (halo, H)

    ck = min(row_chunk, s_t)
    for c0 in range(0, s_t, ck):                       # static unrolled row-chunk loop
        cs = min(ck, s_t - c0)                         # static chunk length
        x_c = x_ref[0, pl.ds(c0, cs), :]               # aligned (cs, H) load

        if halo > 0:
            # Extended window: previous halo rows + this chunk -> (cs + halo, H).
            x_win = jnp.concatenate([prev_tail, x_c], axis=0)
        else:
            x_win = x_c

        # One wide MXU matmul per chunk; f32 accumulation.
        p = jnp.dot(x_win, w, preferred_element_type=jnp.float32)   # (cs+halo, n_gram*H)

        # Accumulate the n-gram contributions as value slices (no misaligned ref RMW).
        acc = bias_f
        for g in range(n_gram):
            shift = n_gram - 1 - g
            acc = acc + p[halo - shift: halo - shift + cs, g * h:(g + 1) * h]

        # Epilogue: tanh + sigmoid gate (EUP); fused form saves a VPU multiply.
        out = jnp.tanh(acc)
        xf = x_c.astype(jnp.float32)
        rate = jax.nn.sigmoid(xf)
        y = xf + rate * (out - xf)                     # == rate*out + (1 - rate)*x

        # Single aligned store per chunk.
        o_ref[0, pl.ds(c0, cs), :] = y.astype(o_ref.dtype)

        if halo > 0:
            prev_tail = x_win[cs:, :]                  # last halo rows -> next chunk


def ngram_mlp_forward(x, weight, bias, n_gram, *, seq_tile=None, row_chunk=128, w_wide=None):
    """NgramMLP forward.

    x:      (B, S, H)
    weight: (H, n_gram*H)  -- PyTorch nn.Linear(n_gram*H, H).weight
    bias:   (H,)
    """
    B, S, H = x.shape
    assert weight.shape == (H, n_gram * H)
    assert n_gram >= 1
    halo = n_gram - 1
    itemsize = jnp.dtype(x.dtype).itemsize

    row_chunk = max(8, (int(row_chunk) // 8) * 8)
    vmem_limit = _default_vmem_limit_bytes()

    if seq_tile is None:
        seq_tile = _default_seq_tile(H, n_gram, itemsize, vmem_limit, row_chunk)
    if seq_tile >= S:
        s_t = S                       # single tile; block dim == full array dim is legal
    else:
        s_t = max(8, (int(seq_tile) // 8) * 8)

    n_seq = _cdiv(S, s_t)
    s_pad = n_seq * s_t

    # Resident weight in wide per-gram-transposed layout (single transpose, no scatter loop).
    if w_wide is None:
        w_wide = prepare_ngram_weight(weight, n_gram)
    b2 = bias.reshape(1, H)

    # Tiny halo input: the (n_gram-1) rows of x preceding each seq tile (zeros before s=0).
    halo_rows = max(halo, 1)
    if halo > 0:
        idx = (jnp.arange(n_seq) * s_t)[:, None] + jnp.arange(-halo, 0)[None, :]   # (n_seq, halo)
        gathered = x[:, jnp.clip(idx, 0, S - 1), :]                                # (B, n_seq, halo, H)
        halo_arr = jnp.where((idx >= 0)[None, :, :, None], gathered,
                             jnp.zeros((), x.dtype))
    else:
        halo_arr = jnp.zeros((B, n_seq, 1, H), x.dtype)

    # Only the (cheap) sequence axis is padded when needed; H stays native in HBM.
    x_in = x
    if s_pad != S:
        x_in = jnp.zeros((B, s_pad, H), x.dtype).at[:, :S, :].set(x)

    kernel = functools.partial(_ngram_mlp_kernel, n_gram=n_gram, s_t=s_t, h=H,
                               row_chunk=row_chunk)

    out = pl.pallas_call(
        kernel,
        out_shape=jax.ShapeDtypeStruct((B, s_pad, H), x.dtype),
        grid_spec=pltpu.PrefetchScalarGridSpec(
            num_scalar_prefetch=0,
            grid=(B, n_seq),
            in_specs=[
                pl.BlockSpec((1, s_t, H), lambda b, j: (b, j, 0)),
                pl.BlockSpec((1, 1, halo_rows, H), lambda b, j: (b, j, 0, 0)),
                pl.BlockSpec((H, n_gram * H), lambda b, j: (0, 0)),
                pl.BlockSpec((1, H), lambda b, j: (0, 0)),
            ],
            out_specs=pl.BlockSpec((1, s_t, H), lambda b, j: (b, j, 0)),
        ),
        compiler_params=pltpu.CompilerParams(
            # Both axes are independent now (halo is an input) -> megacore-friendly on v7x.
            dimension_semantics=("parallel", "parallel"),
            vmem_limit_bytes=vmem_limit,
        ),
    )(x_in, halo_arr, w_wide, b2)

    if s_pad != S:
        out = out[:, :S, :]
    return out


def ngram_mlp_reference(x, weight, bias, n_gram):
    """Pure-JAX reference mirroring the PyTorch forward (eval mode)."""
    B, S, H = x.shape
    shifted = []
    for g in range(n_gram):
        shift = n_gram - 1 - g
        if shift == 0:
            shifted.append(x)
        else:
            pad = jnp.zeros((B, shift, H), x.dtype)
            shifted.append(jnp.concatenate([pad, x[:, :S - shift, :]], axis=1))
    zz = jnp.concatenate(shifted, axis=-1).reshape(B * S, n_gram * H)
    out = jnp.tanh(zz @ weight.T + bias).reshape(B, S, H)
    rate = jax.nn.sigmoid(x)
    return rate * out + (1.0 - rate) * x


if __name__ == "__main__":
    n_gram = 3
    input_size = 32   # H
    batch = 2
    seq = 8

    key = jax.random.PRNGKey(0)
    kx, kw, kb = jax.random.split(key, 3)

    x = jax.random.normal(kx, (batch, seq, input_size), dtype=jnp.float32)
    # Deterministic Linear(n_gram*H -> H) params (uniform like PyTorch default).
    fan_in = n_gram * input_size
    limit = 1.0 / jnp.sqrt(jnp.float32(fan_in))
    weight = jax.random.uniform(
        kw, (input_size, n_gram * input_size), jnp.float32, -limit, limit)
    bias = jax.random.uniform(kb, (input_size,), jnp.float32, -limit, limit)

    # Small demo shape (single seq tile, single row chunk).
    y = jax.block_until_ready(ngram_mlp_forward(x, weight, bias, n_gram))
    y_ref = ngram_mlp_reference(x, weight, bias, n_gram)
    assert jnp.allclose(y, y_ref, atol=1e-5, rtol=1e-5), "mismatch vs reference"

    # Exercise the multi-tile / multi-chunk / padded-S path, with the wide weight
    # prebuilt once on the host (hoisted out of the forward path).
    seq2 = 40
    x2 = jax.random.normal(jax.random.PRNGKey(1), (batch, seq2, input_size),
                           dtype=jnp.float32)
    w_wide = prepare_ngram_weight(weight, n_gram)
    y2 = jax.block_until_ready(
        ngram_mlp_forward(x2, weight, bias, n_gram, seq_tile=16, row_chunk=8,
                          w_wide=w_wide))
    y2_ref = ngram_mlp_reference(x2, weight, bias, n_gram)
    assert jnp.allclose(y2, y2_ref, atol=1e-5, rtol=1e-5), "mismatch (tiled path)"

    print("KERNEL_OK")
</pallas_src>

<mosaic_0001>
module attributes {stable_mosaic.version = 11 : i64} {
  func.func @_ngram_mlp_kernel(%arg0: i32, %arg1: i32, %arg2: memref<1x8x32xf32, #tpu.memory_space<vmem>>, %arg3: memref<1x1x2x32xf32, #tpu.memory_space<vmem>>, %arg4: memref<32x96xf32, #tpu.memory_space<vmem>>, %arg5: memref<1x32xf32, #tpu.memory_space<vmem>>, %arg6: memref<1x8x32xf32, #tpu.memory_space<vmem>>) attributes {dimension_semantics = [#tpu.dimension_semantics<parallel>, #tpu.dimension_semantics<parallel>], iteration_bounds = array<i64: 2, 1>, scalar_prefetch = 0 : i64, scratch_operands = 0 : i64, tpu.core_type = #tpu.core_type<tc>, window_params = [{transform_indices = @transform_0, window_bounds = array<i64: 1, 8, 32>}, {transform_indices = @transform_1, window_bounds = array<i64: 1, 1, 2, 32>}, {pipeline_mode = #tpu.pipeline_mode<synchronous>, transform_indices = @transform_2, window_bounds = array<i64: 32, 96>}, {pipeline_mode = #tpu.pipeline_mode<synchronous>, transform_indices = @transform_3, window_bounds = array<i64: 1, 32>}, {transform_indices = @transform_4, window_bounds = array<i64: 1, 8, 32>}]} {
    %c0 = arith.constant 0 : index
    %c0_0 = arith.constant 0 : index
    %0 = vector.load %arg4[%c0, %c0_0] : memref<32x96xf32, #tpu.memory_space<vmem>>, vector<32x96xf32>
    %c0_1 = arith.constant 0 : index
    %c0_2 = arith.constant 0 : index
    %1 = vector.load %arg5[%c0_1, %c0_2] : memref<1x32xf32, #tpu.memory_space<vmem>>, vector<1x32xf32>
    %c0_3 = arith.constant 0 : index
    %c0_4 = arith.constant 0 : index
    %c0_5 = arith.constant 0 : index
    %c0_6 = arith.constant 0 : index
    %2 = vector.load %arg3[%c0_3, %c0_4, %c0_5, %c0_6] : memref<1x1x2x32xf32, #tpu.memory_space<vmem>>, vector<1x1x2x32xf32>
    %3 = vector.shape_cast %2 : vector<1x1x2x32xf32> to vector<2x32xf32>
    %c0_7 = arith.constant 0 : index
    %c0_8 = arith.constant 0 : index
    %c0_9 = arith.constant 0 : index
    %4 = vector.load %arg2[%c0_7, %c0_8, %c0_9] : memref<1x8x32xf32, #tpu.memory_space<vmem>>, vector<1x8x32xf32>
    %5 = vector.shape_cast %4 : vector<1x8x32xf32> to vector<8x32xf32>
    %6 = tpu.concatenate %3, %5 in 0 : vector<2x32xf32>, vector<8x32xf32> -> vector<10x32xf32>
    %cst = arith.constant dense<0.000000e+00> : vector<10x96xf32>
    %7 = tpu.matmul %6, %0, %cst {dimension_numbers = #tpu.dot_dimension_numbers<[1], [0], [0], [1], [0, 0, 1, 1], [], []>} : vector<10x32xf32>, vector<32x96xf32>, vector<10x96xf32> -> vector<10x96xf32>
    %8 = vector.extract_strided_slice %7 {offsets = [0, 0], sizes = [8, 32], strides = [1, 1]} : vector<10x96xf32> to vector<8x32xf32>
    %9 = vector.broadcast %1 : vector<1x32xf32> to vector<8x32xf32>
    %10 = arith.addf %9, %8 : vector<8x32xf32>
    %11 = vector.extract_strided_slice %7 {offsets = [1, 32], sizes = [8, 32], strides = [1, 1]} : vector<10x96xf32> to vector<8x32xf32>
    %12 = arith.addf %10, %11 : vector<8x32xf32>
    %13 = vector.extract_strided_slice %7 {offsets = [2, 64], sizes = [8, 32], strides = [1, 1]} : vector<10x96xf32> to vector<8x32xf32>
    %14 = arith.addf %12, %13 : vector<8x32xf32>
    %15 = math.tanh %14 : vector<8x32xf32>
    %16 = arith.negf %5 : vector<8x32xf32>
    %17 = math.exp %16 : vector<8x32xf32>
    %cst_10 = arith.constant 1.000000e+00 : f32
    %18 = vector.broadcast %cst_10 : f32 to vector<8x32xf32>
    %19 = arith.addf %18, %17 : vector<8x32xf32>
    %20 = arith.divf %18, %19 : vector<8x32xf32>
    %21 = arith.subf %15, %5 : vector<8x32xf32>
    %22 = arith.mulf %20, %21 : vector<8x32xf32>
    %23 = arith.addf %5, %22 : vector<8x32xf32>
    %c0_11 = arith.constant 0 : index
    %c0_12 = arith.constant 0 : index
    %c0_13 = arith.constant 0 : index
    %24 = vector.load %arg6[%c0_11, %c0_12, %c0_13] : memref<1x8x32xf32, #tpu.memory_space<vmem>>, vector<1x8x32xf32>
    %25 = vector.shape_cast %24 : vector<1x8x32xf32> to vector<8x32xf32>
    %26 = vector.shape_cast %23 : vector<8x32xf32> to vector<1x8x32xf32>
    tpu.vector_store %arg6[%c0_11, %c0_12, %c0_13], %26 {strides = array<i32>} : memref<1x8x32xf32, #tpu.memory_space<vmem>>, vector<1x8x32xf32>,
    return
  }
  func.func @transform_0(%arg0: i32, %arg1: i32) -> (i32, i32, i32) {
    %c0_i32 = arith.constant 0 : i32
    %c0_i32_0 = arith.constant 0 : i32
    return %arg0, %arg1, %c0_i32 : i32, i32, i32
  }
  func.func @transform_1(%arg0: i32, %arg1: i32) -> (i32, i32, i32, i32) {
    %c0_i32 = arith.constant 0 : i32
    %c0_i32_0 = arith.constant 0 : i32
    %c0_i32_1 = arith.constant 0 : i32
    return %arg0, %arg1, %c0_i32, %c0_i32_0 : i32, i32, i32, i32
  }
  func.func @transform_2(%arg0: i32, %arg1: i32) -> (i32, i32) {
    %c0_i32 = arith.constant 0 : i32
    %c0_i32_0 = arith.constant 0 : i32
    %c0_i32_1 = arith.constant 0 : i32
    return %c0_i32, %c0_i32_0 : i32, i32
  }
  func.func @transform_3(%arg0: i32, %arg1: i32) -> (i32, i32) {
    %c0_i32 = arith.constant 0 : i32
    %c0_i32_0 = arith.constant 0 : i32
    %c0_i32_1 = arith.constant 0 : i32
    return %c0_i32, %c0_i32_0 : i32, i32
  }
  func.func @transform_4(%arg0: i32, %arg1: i32) -> (i32, i32, i32) {
    %c0_i32 = arith.constant 0 : i32
    %c0_i32_0 = arith.constant 0 : i32
    return %arg0, %arg1, %c0_i32 : i32, i32, i32
  }
}

</mosaic_0001>

<bundles_post_ra>
// kernel: tpu_custom_call.1
= control target key start
LH: loop header
LB: loop body
LE: loop exit
PB: predicated region body
PF: predicated region fallthrough
CT: control target
= control target key end

     0   :  { %s1003_s0 = inlined_call_operand.hbm [shape: f32[2,8,32], index: 0, kind: input, shape index: {}]   ;;  %s1004_s1 = inlined_call_operand.hbm [shape: f32[2,1,2,32], index: 1, kind: input, shape index: {}]   ;;  %s1005_s2 = inlined_call_operand.hbm [shape: f32[32,96], index: 2, kind: input, shape index: {}]   ;;  %s1006_s3 = inlined_call_operand.vmem [shape: f32[1,32], index: 3, kind: input, shape index: {}]   ;;  %s1007_s4 = inlined_call_operand.hbm [shape: f32[2,8,32], index: 4, kind: output, shape index: {}]  }
   0x1   :  { %1012 = sst [smem:[#allocation18_spill]] %s1005_s2 }
   0x2   :  { %9 = vsyncpa [#allocation3], 0 }
   0x3   :  { %11 = vsyncpa [#allocation3 + $0x1], 0 }
   0x4   :  { %12 = vsyncpa [#allocation6], 0 }
   0x5   :  { %14 = vsyncpa [#allocation6 + $0x1], 0 }
   0x6   :  { %15 = vsyncpa [#allocation4], 0 }
   0x7   :  { %17 = vsyncpa [#allocation4 + $0x1], 0  ;;  %s833_s15 = smov 0   ;;  %s835_s16 = smov 0  }
   0x8   :  { %s837_s17 = smov 0   ;;  %s839_s18 = smov 0  }
   0x9   :  { %s841_s19 = smov 0   ;;  %s843_s20 = smov 0  }
   0xa LB: > { %1013 = sst [smem:[#allocation13_spill]] %s781_s15  ;;  %s864_s21 = sadd.s32 4294967295, %s801_s20   ;;  %s801_s20 = sphi %s843_s20, %s23_s20   ;;  %s797_s19 = sphi %s841_s19, %s1032_s19   ;;  %s793_s18 = sphi %s839_s18, %s1031_s18   ;;  %s789_s17 = sphi %s837_s17, %s1027_s17   ;;  %s785_s16 = sphi %s835_s16, %s1030_s16   ;;  %s781_s15 = sphi %s833_s15, %s1029_s15  }
   0xb   : > { %1014 = sst [smem:[#allocation14_spill]] %s789_s17  ;;  %p509_p0 = scmp.ge.s32.totalorder %s801_s20, 1 }
   0xc   : > { %p58_p1 = scmp.eq.s32.totalorder %s864_s21, 0  ;;  %p166_p2 = scmp.lt.s32.totalorder %s801_s20, 3 }
   0xd   : > { %s1015_s2 = sld [smem:[#allocation18_spill]]  ;;  %s803_s26 = smov [#allocation7]  }
   0xe   : > { %p872_p3 = pnand %p509_p0, %p166_p2  ;;  %s179_s27 = sshll.u32 %s803_s26, 4  ;;  %s180_s27 = int_to_ptr.vmem [resolvable:$true] %s179_s27 }
   0xf   : > { %p511_p6 = scmp.ge.s32.totalorder %s801_s20, 2  ;;  %s804_s28 = smov 128  }
  0x10   : > { %p542_p4 = pneg %p872_p3  ;;  %s805_s29 = smov 8  }
  0x11   : > { %s508_s30 = sadd.s32 4294967294, %s801_s20   ;;  %s35_s5 = sadd.s32 1, %s797_s19 }
  0x12   : > { %p543_p5 = pnand %p542_p4, %p58_p1  ;;  %s44_s6 = sadd.s32 1, %s789_s17 }
  0x13   : > { %s177_s24 = sshll.u32 %s1015_s2, 4  ;;  %p37_p7 = scmp.ge.s32.totalorder %s35_s5, 2  ;;  %s178_s24 = int_to_ptr.hbm [resolvable:$true] %s177_s24 }
  0x14   : > { %545 = dma.hbm_to_vmem [thread:$0]  (!%p543_p5), %s178_s24, 512, %s180_s27, [#allocation6], %s804_s28, %s804_s28, %s805_s29  }
  0x15   : > { %p51_p8 = scmp.ne.s32.totalorder %s789_s17, %s785_s16  ;;  %p52_p9 = scmp.eq.s32.totalorder %s801_s20, 0 }
  0x16   : > { %p57_p10 = scmp.ne.s32.totalorder %s785_s16, %s781_s15  ;;  %s1034_s5 = smov (%p37_p7, %s35_s5), 0 }
  0x17   : > { %1017 = sst [smem:[#allocation15_spill]] %s1034_s5  ;;  %p891_p11 = por %p52_p9, %p51_p8 }
  0x18   : > { %p897_p12 = por %p58_p1, %p57_p10  ;;  %s39_s9 = ssub.s32 %s797_s19, %s1034_s5 }
  0x19   : > { %p153_p13 = scmp.eq.s32.totalorder %s864_s21, 1  ;;  %p42_p0 = scmp.eq.s32.totalorder %s39_s9, 0 }
  0x1a   : > { %p159_p2 = scmp.eq.s32.totalorder %s508_s30, 1  ;;  %p558_p5 = scmp.lt.s32.totalorder %s801_s20, 2 }
  0x1b   : > { %p904_p4 = por %p153_p13, %p51_p8  ;;  %s196_s13 = sand.u32 1, %s789_s17  }
  0x1c   : > { %s910_s11 = scalar_select %p42_p0, %s789_s17, %s44_s6  }
  0x1d   : > { %p912_p7 = por %p159_p2, %p57_p10  ;;  %s512_s14 = sshll.u32 %s196_s13, 3 }
  0x1e   : > { %1021 = sst [smem:[#allocation16_spill]] %s910_s11  ;;  %s513_s22 = sshll.u32 %s797_s19, 3 }
  0x1f   : > { %s1022_s12 = scalar_select %p912_p7, 1, 0 }
  0x20   : > { %s205_s26 = scalar_lea.hbm %s1003_s0, %s513_s22  ;;  %s200_s27 = scalar_lea.vmem [#allocation2], %s512_s14 }
  0x21   : > { %1023 = sst [smem:[#allocation17_spill]] %s1022_s12  ;;  %s209_s28 = sshll.u32 %s200_s27, 4  ;;  %s210_s28 = int_to_ptr.vmem [resolvable:$true] %s209_s28 }
  0x22   : > { %s207_s29 = sshll.u32 %s205_s26, 4  ;;  %p547_p8 = pnand %p558_p5, %p891_p11  ;;  %s208_s29 = int_to_ptr.hbm [resolvable:$true] %s207_s29 }
  0x23   : > { %s216_s30 = sand.u32 1, %s801_s20   ;;  %s514_s6 = sshll.u32 %s196_s13, 1 }
  0x24   : > { %s197_s9 = scalar_lea.sflag [#allocation3], %s196_s13  ;;  %s515_s2 = sshll.u32 %s797_s19, 1 }
  0x25   : > { %549 = dma.hbm_to_vmem [thread:$0]  (!%p547_p8), %s208_s29, 128, %s210_s28, %s197_s9  }
  0x26   : > { %s225_s17 = scalar_lea.hbm %s1004_s1, %s515_s2  ;;  %s220_s12 = scalar_lea.vmem [#allocation5], %s514_s6 }
  0x27   : > { %s229_s15 = sshll.u32 %s220_s12, 4  ;;  %s227_s23 = sshll.u32 %s225_s17, 4  ;;  %s230_s15 = int_to_ptr.vmem [resolvable:$true] %s229_s15  ;;  %s228_s23 = int_to_ptr.hbm [resolvable:$true] %s227_s23 }
  0x28   : > { %s217_s14 = scalar_lea.sflag [#allocation6], %s216_s30  ;;  %238 = sbr.rel (%p872_p3) target bundleno = 329 (0x149), region = 36 }
  0x29   : > { %552 = dma.hbm_to_vmem [thread:$0]  (!%p547_p8), %s228_s23, 32, %s230_s15, %s217_s14  }
  0x2a   : > { %s931_s7 = sand.u32 (!%p872_p3), 1, %s785_s16  }
  0x2b   : > { %s517_s13 = sshll.u32 (!%p872_p3), %s931_s7, 3  ;;  %s241_s5 = scalar_lea.sflag (!%p872_p3), [#allocation3], %s931_s7 }
  0x2c   : > { %s244_s2 = scalar_lea.vmem (!%p872_p3), [#allocation2], %s517_s13 }
  0x2d   : > { %764 = dma.done.wait (%p897_p12), %s241_s5, 128  }
  0x2e   : > { %766 = vsyncadd (%p897_p12), %s241_s5, 4294967168  ;;  %s250_s15 = sand.u32 1, %s864_s21   ;;  %s518_s17 = sshll.u32 %s931_s7, 1 }
  0x2f   : > { %s251_s25 = scalar_lea.sflag [#allocation6], %s250_s15  ;;  %s254_s11 = scalar_lea.vmem [#allocation5], %s518_s17 }
  0x30   : > { %768 = dma.done.wait (%p897_p12), %s251_s25, 32  }
  0x31   : > { %770 = vsyncadd (%p897_p12), %s251_s25, 4294967264 }
  0x32   : > { %772 = dma.done.wait (%p58_p1), [#allocation6], 512  }
  0x33   : > { %774 = vsyncadd (%p58_p1), [#allocation6], 4294966784  ;;  %v293_v0 = vld [vmem:[#allocation7 + $0x18] sm:$0xff]  ;;  %v292_v1 = vld [vmem:[#allocation7 + $0x10] sm:$0xff]  ;;  %vm300_vm0 = vcmask 1041408   ;;  %vm302_vm1 = vcmask 261120  }
  0x34   : > { %320 = vmatpush.msra.mxu0 %v293_v0  ;;  %528 = vmatpush.msra.mxu1 %v293_v0  ;;  %v951_v2 = vld [vmem:[%s244_s2] sm:$0xff]  ;;  %v295_v4 = vld [vmem:[%s254_s11] sm:$0x3]  ;;  %v290_v6 = vld [vmem:[#allocation7] sm:$0xff]  ;;  %vm337_vm2 = vcmask 1046528   ;;  %s806_s21 = smov 96  }
  0x35   : > { %v291_v3 = vld [vmem:[#allocation7 + $0x8] sm:$0xff]  ;;  %v298_v5 = vrot.slane %v951_v2, 6  ;;  %vm345_vm3 = vcmask 1045504   ;;  %s807_s8 = smov 64   ;;  %v523_v16 = vmul.f32 -1.442695, %v951_v2 }
  0x36   : > { %321 = vmatpush.msra.mxu0 %v292_v1  ;;  %529 = vmatpush.msra.mxu1 %v292_v1  ;;  %v614_v22 = vld [vmem:[%s1006_s3] ss:$0 sm:$0xff]  ;;  %s525_s24 = sshll.u32 %s793_s18, 3  ;;  %s289_s29 = scalar_lea.vmem [#allocation8], %s517_s13 }
  0x37   : > { %v301_v7 = vsel %vm300_vm0, %v295_v4, %v298_v5  ;;  %615 = vpow2.f32 %v523_v16  ;;  %s389_s28 = scalar_lea.hbm %s1007_s4, %s525_s24  ;;  %s391_s30 = sshll.u32 %s289_s29, 4  ;;  %s392_s30 = int_to_ptr.vmem [resolvable:$true] %s391_s30 }
  0x38   : > { %322 = vmatpush.msra.mxu0 %v291_v3  ;;  %530 = vmatpush.msra.mxu1 %v291_v3  ;;  %s393_s6 = sshll.u32 %s389_s28, 4  ;;  %s378_s18 = scalar_lea.sflag [#allocation4], %s931_s7  ;;  %s394_s6 = int_to_ptr.hbm [resolvable:$true] %s393_s6 }
  0x39   : > { %s725_s9 = sshra.s32 %s394_s6, 4  ;;  %s731_s13 = scalar_lea.hbm %s1007_s4, 16  ;;  %s726_s9 = int_to_ptr.hbm [resolvable:$true] %s725_s9 }
  0x3a   : > { %323 = vmatpush.msra.mxu0 %v290_v6  ;;  %531 = vmatpush.msra.mxu1 %v290_v6  ;;  %s727_s23 = scalar_lea.hbm %s726_s9, 8  ;;  %p732_p10 = scmp.lt.s32.totalorder %s726_s9, %s1007_s4 }
  0x3b   : > { %521 = vmatmul.msk.f32.vlgmr.msra.gmra.mxu0 %vm302_vm1, %v301_v7  ;;  %522 = vmatmul.msk.f32.vlgmr.msra.gmra.mxu1 %vm302_vm1, %v298_v5  ;;  %p728_p1 = scmp.ne.s32.totalorder %s726_s9, %s727_s23  ;;  %p733_p11 = scmp.lt.s32.totalorder %s731_s13, %s727_s23 }
  0x3d   : > { %v616_v17 = vpop.eup %615  ;;  %p729_p3 = pnand %p728_p1, %p904_p4  ;;  %p734_p12 = por %p733_p11, %p732_p10 }
  0x3e   : > { %v357_v18 = vadd.f32 1.0, %v616_v17 }
  0x3f   : > { %p730_p9 = pneg %p729_p3 }
  0x40   : > { %617 = vrcp.f32 %v357_v18  ;;  %vm363_vm4 = vweird.f32 %v357_v18  ;;  %v369_v28 = vand.u32 2147483648, %v357_v18  ;;  %v367_v31 = vand.u32 2147483647, %v357_v18 }
  0x41   : > { %p735_p13 = pnand %p734_p12, %p730_p9 }
  0x42   : > { %v370_v32 = vor.u32 1.1754944e-38, %v369_v28  ;;  %vm368_vm7 = vcmp.eq.f32.partialorder %v367_v31, 8.507059e+37 }
  0x46   : > { %v618_v19 = vpop.eup %617 }
  0x47   : > { %v359_v20 = vmul.f32 %v618_v19, %v357_v18  ;;  %vm364_vm5 = vweird.f32 %v618_v19 }
  0x48   : > { %vm365_vm6 = vmor %vm363_vm4, %vm364_vm5 }
  0x49   : > { %v360_v23 = vsub.f32 1.0, %v359_v20 }
  0x4b   : > { %v361_v25 = vmul.f32 %v618_v19, %v360_v23 }
  0x4d   : > { %v362_v30 = vadd.f32 %v618_v19, %v361_v25 }
  0x4f   : > { %v366_v33 = vsel %vm365_vm6, %v618_v19, %v362_v30 }
  0x50   : > { %v371_v35 = vsel %vm368_vm7, %v370_v32, %v366_v33 }
  0xb8   : > { %v325_v8 = vpop.f32.mrf.mxu0  ;;  %v328_v9 = vpop.f32.mrf.mxu1 }
  0xb9   : > { %v338_v10 = vrot.slane %v325_v8, 1  ;;  %v339_v11 = vrot.slane %v328_v9, 1  ;;  %v346_v13 = vrot.slane %v325_v8, 2  ;;  %v347_v14 = vrot.slane %v328_v9, 2 }
  0xba   : > { %v334_v24 = vadd.f32 %v614_v22, %v325_v8 }
  0xbb   : > { %v340_v12 = vsel %vm337_vm2, %v338_v10, %v339_v11  ;;  %v348_v15 = vsel %vm345_vm3, %v346_v13, %v347_v14 }
  0xbc   : > { %341 = vrot.lane.b32.xlu0 %v340_v12, %s806_s21 }
  0xc4   : > { %349 = vrot.lane.b32.xlu0 %v348_v15, %s807_s8 }
 0x12e   : > { %v342_v21 = vpop.permute.xlu0 %341 }
 0x12f   : > { %v344_v26 = vadd.f32 %v342_v21, %v334_v24 }
 0x136   : > { %v350_v27 = vpop.permute.xlu0 %349 }
 0x137   : > { %v352_v29 = vadd.f32 %v350_v27, %v344_v26 }
 0x139   : > { %619 = vtanh.f32 %v352_v29 }
 0x13f   : > { %v620_v34 = vpop.eup %619 }
 0x140   : > { %v373_v36 = vsub.f32 %v620_v34, %v951_v2 }
 0x142   : > { %v374_v37 = vmul.f32 %v373_v36, %v371_v35 }
 0x144   : > { %v375_v38 = vadd.f32 %v374_v37, %v951_v2 }
 0x146   : > { %376 = vst.msk [vmem:[%s289_s29] sm:$0xff] %vm302_vm1, %v375_v38 }
 0x147   : > { %738 = shalt.err (!%p735_p13)
}
 0x148   : > { %540 = dma.vmem_to_hbm [thread:$0]  (%p904_p4), %s392_s30, 128, %s394_s6, %s378_s18  }
 0x149 PF: > { %s1024_s7 = sld [smem:[#allocation13_spill]]  ;;  %p554_p0 = pnand %p511_p6, %p912_p7 }
 0x14b   : > { %p555_p2 = pneg %p554_p0 }
 0x14f   : > { %s405_s25 = sand.u32 1, %s1024_s7  }
 0x150   : > { %s406_s11 = scalar_lea.sflag [#allocation4], %s405_s25 }
 0x151   : > { %776 = dma.done.wait (%p555_p2), %s406_s11, 128  }
 0x152   : > { %778 = vsyncadd (%p555_p2), %s406_s11, 4294967168  ;;  %s23_s20 = sadd.s32 1, %s801_s20   ;;  %s1026_s21 = sld [smem:[#allocation14_spill]] }
 0x153   : > { %p20_p5 = scmp.ge.s32.totalorder %s23_s20, 4   ;;  %s1027_s17 = sld [smem:[#allocation16_spill]] }
 0x154   : > { %s1028_s10 = sld [smem:[#allocation15_spill]]  ;;  %s1029_s15 = smov %s785_s16 }
 0x155   : > { %s1031_s18 = smov %s797_s19 }
 0x156   :  { %22 = sbr.rel (!%p20_p5) target bundleno = 10 (0xa), region = 98 }
 0x158   : > { %s1030_s16 = smov %s1026_s21 }
 0x15a   : > { %s1032_s19 = smov %s1028_s10 }
 0x15b   :  { %412 = vsyncpa [#allocation3], 1 }
 0x15c   :  { %414 = vsyncpa [#allocation3 + $0x1], 1 }
 0x15d   :  { %415 = vsyncpa [#allocation6], 1 }
 0x15e   :  { %417 = vsyncpa [#allocation6 + $0x1], 1 }
 0x15f   :  { %418 = vsyncpa [#allocation4], 1 }
 0x160   :  { %420 = vsyncpa [#allocation4 + $0x1], 1 }

</bundles_post_ra>
